<compile_context>
chip_gen: v5e
topology: v5e:2x2
jax: 0.10.0
libtpu: 0.0.40
codegen_flags: <defaults>
</compile_context>

<pallas_src>
import jax
import jax.numpy as jnp
from jax import lax
from jax.experimental import pallas as pl
from jax.experimental.pallas import tpu as pltpu

_PAD = 8  # sublane-aligned offset for the zero-padded conv scratch slab
_BN_EPS = 1e-5


def _sigmoid(v):
    return 1.0 / (1.0 + jnp.exp(-v))


def basic_block_kernel(x_ref,
                       bn1_s_ref, bn1_t_ref, w1_ref, b1_ref,
                       bn2_s_ref, bn2_t_ref, w2_ref, b2_ref,
                       wse1_ref, wse2_ref,
                       wd1_ref, wd2_ref, wd3_ref,
                       wres_ref, bres_ref,
                       out_ref,
                       pad1_ref, pad2_ref):
    """One batch element per grid step. x_ref: (1, L, Cin) channels-last."""
    L = x_ref.shape[1]
    P = _PAD

    x = x_ref[0]                                            # (L, Cin)

    # ---- BN1 (eval-mode, folded to scale/shift) + ReLU ----
    a1 = jnp.maximum(x * bn1_s_ref[...] + bn1_t_ref[...], 0.0)

    # ---- Conv1 (k=3, pad=1): three shifted MXU matmuls via padded scratch ----
    pad1_ref[...] = jnp.zeros(pad1_ref.shape, pad1_ref.dtype)
    pad1_ref[P:P + L, :] = a1                               # aligned store
    y1 = (jnp.dot(pad1_ref[P - 1:P - 1 + L, :], w1_ref[0],
                  preferred_element_type=jnp.float32)
          + jnp.dot(pad1_ref[P:P + L, :], w1_ref[1],
                    preferred_element_type=jnp.float32)
          + jnp.dot(pad1_ref[P + 1:P + 1 + L, :], w1_ref[2],
                    preferred_element_type=jnp.float32)
          + b1_ref[...])                                    # (L, Cout)

    # ---- BN2 + ReLU ----
    a2 = jnp.maximum(y1 * bn2_s_ref[...] + bn2_t_ref[...], 0.0)

    # ---- Conv2 (k=3, pad=1) ----
    pad2_ref[...] = jnp.zeros(pad2_ref.shape, pad2_ref.dtype)
    pad2_ref[P:P + L, :] = a2
    y2 = (jnp.dot(pad2_ref[P - 1:P - 1 + L, :], w2_ref[0],
                  preferred_element_type=jnp.float32)
          + jnp.dot(pad2_ref[P:P + L, :], w2_ref[1],
                    preferred_element_type=jnp.float32)
          + jnp.dot(pad2_ref[P + 1:P + 1 + L, :], w2_ref[2],
                    preferred_element_type=jnp.float32)
          + b2_ref[...])                                    # (L, Cout)

    # ---- DualSEBlock: both branches share the mean-over-length pooling ----
    pooled = jnp.mean(y2, axis=0, keepdims=True)            # (1, Cout)
    se = _sigmoid(
        jnp.dot(jnp.maximum(jnp.dot(pooled, wse1_ref[...],
                                    preferred_element_type=jnp.float32), 0.0),
                wse2_ref[...], preferred_element_type=jnp.float32))
    d = jnp.maximum(jnp.dot(pooled, wd1_ref[...],
                            preferred_element_type=jnp.float32), 0.0)
    d = jnp.maximum(jnp.dot(d, wd2_ref[...],
                            preferred_element_type=jnp.float32), 0.0)
    dual = _sigmoid(jnp.dot(d, wd3_ref[...],
                            preferred_element_type=jnp.float32))
    gated = y2 * (se + dual)            # == y2*y_se + y2*y_dual, fused

    # ---- residual branch: 1x1 conv (identity weights are passed if Cin==Cout) ----
    res = jnp.dot(x, wres_ref[...], preferred_element_type=jnp.float32) + bres_ref[...]

    out_ref[0] = gated + res


def basic_block_forward(x_ncl, params, eps=_BN_EPS):
    """x_ncl: (B, C_in, L), channels-first like the PyTorch module."""
    p = params
    B, Cin, L = x_ncl.shape
    Cout = p["conv1_w"].shape[0]

    # ---- host-side layout plumbing & constant folding (no kernel work) ----
    x_blc = jnp.transpose(x_ncl, (0, 2, 1)).astype(jnp.float32)     # (B, L, Cin)

    def fold_bn(gamma, beta, mean, var):
        s = gamma / jnp.sqrt(var + eps)
        return s[None, :], (beta - mean * s)[None, :]

    # TODO(synk): training-mode BatchNorm (batch statistics) is not implemented;
    # eval-mode running stats are folded into scale/shift here.
    bn1_s, bn1_t = fold_bn(p["bn1_gamma"], p["bn1_beta"], p["bn1_mean"], p["bn1_var"])
    bn2_s, bn2_t = fold_bn(p["bn2_gamma"], p["bn2_beta"], p["bn2_mean"], p["bn2_var"])

    w1 = jnp.transpose(p["conv1_w"], (2, 1, 0))     # (3, Cin, Cout)
    b1 = p["conv1_b"][None, :]
    w2 = jnp.transpose(p["conv2_w"], (2, 1, 0))     # (3, Cout, Cout)
    b2 = p["conv2_b"][None, :]

    wse1 = p["fc1_se_w"].T                          # (Cout, Cout//r)
    wse2 = p["fc2_se_w"].T                          # (Cout//r, Cout)
    wd1 = p["fc1_dual_w"].T                         # (Cout, Cout//r)
    wd2 = p["fc2_dual_w"].T                         # (Cout//r, Cout//2)
    wd3 = p["fc3_dual_w"].T                         # (Cout//2, Cout)

    if "res_w" in p:                                # in_channels != out_channels
        wres = jnp.transpose(p["res_w"][:, :, 0], (1, 0))   # (Cin, Cout)
        bres = p["res_b"][None, :]
    else:                                           # identity residual
        wres = jnp.eye(Cin, dtype=jnp.float32)
        bres = jnp.zeros((1, Cin), jnp.float32)

    args = (x_blc, bn1_s, bn1_t, w1, b1, bn2_s, bn2_t, w2, b2,
            wse1, wse2, wd1, wd2, wd3, wres, bres)

    def resident(arr):                  # whole array stays in VMEM across the grid
        nd = arr.ndim
        return pl.BlockSpec(arr.shape, lambda b: (0,) * nd)

    in_specs = ([pl.BlockSpec((1, L, Cin), lambda b: (b, 0, 0))]
                + [resident(a) for a in args[1:]])
    out_specs = pl.BlockSpec((1, L, Cout), lambda b: (b, 0, 0))

    out_blc = pl.pallas_call(
        basic_block_kernel,
        out_shape=jax.ShapeDtypeStruct((B, L, Cout), jnp.float32),
        grid=(B,),
        in_specs=in_specs,
        out_specs=out_specs,
        scratch_shapes=[pltpu.VMEM((L + 2 * _PAD, Cin), jnp.float32),
                        pltpu.VMEM((L + 2 * _PAD, Cout), jnp.float32)],
        compiler_params=pltpu.CompilerParams(
            dimension_semantics=("parallel",)),     # megacore split on v7x
    )(*args)

    return jnp.transpose(out_blc, (0, 2, 1))        # back to (B, Cout, L)


def basic_block_reference(x, p, eps=_BN_EPS):
    """Pure-JAX mirror of the PyTorch forward (eval-mode BN), for validation."""
    hp = jax.lax.Precision.HIGHEST

    def bn(v, g, b, m, var):
        return ((v - m[None, :, None]) * (g / jnp.sqrt(var + eps))[None, :, None]
                + b[None, :, None])

    def conv1d(v, w, b, pad):
        y = lax.conv_general_dilated(v, w, window_strides=(1,),
                                     padding=[(pad, pad)],
                                     dimension_numbers=("NCH", "OIH", "NCH"),
                                     precision=hp)
        return y if b is None else y + b[None, :, None]

    lin = lambda v, w: jnp.dot(v, w.T, precision=hp)

    out = jnp.maximum(bn(x, p["bn1_gamma"], p["bn1_beta"], p["bn1_mean"], p["bn1_var"]), 0.0)
    out = conv1d(out, p["conv1_w"], p["conv1_b"], 1)
    out = jnp.maximum(bn(out, p["bn2_gamma"], p["bn2_beta"], p["bn2_mean"], p["bn2_var"]), 0.0)
    out = conv1d(out, p["conv2_w"], p["conv2_b"], 1)

    pooled = jnp.mean(out, axis=2)                                   # (B, Cout)
    y_se = _sigmoid(lin(jnp.maximum(lin(pooled, p["fc1_se_w"]), 0.0), p["fc2_se_w"]))
    y_d = jnp.maximum(lin(pooled, p["fc1_dual_w"]), 0.0)
    y_d = jnp.maximum(lin(y_d, p["fc2_dual_w"]), 0.0)
    y_d = _sigmoid(lin(y_d, p["fc3_dual_w"]))
    out = out * y_se[:, :, None] + out * y_d[:, :, None]

    residual = conv1d(x, p["res_w"], p["res_b"], 0) if "res_w" in p else x
    return out + residual


def init_params(key, in_channels, out_channels, se_reduction=16):
    Cin, Cout = in_channels, out_channels
    red, half = Cout // se_reduction, Cout // 2
    ks = jax.random.split(key, 19)
    u = lambda k, shape, s=0.1: jax.random.uniform(k, shape, jnp.float32, -s, s)
    pos = lambda k, shape: jax.random.uniform(k, shape, jnp.float32, 0.5, 1.5)
    p = {
        "bn1_gamma": pos(ks[0], (Cin,)),  "bn1_beta": u(ks[1], (Cin,)),
        "bn1_mean": u(ks[2], (Cin,)),     "bn1_var": pos(ks[3], (Cin,)),
        "conv1_w": u(ks[4], (Cout, Cin, 3), 0.2),  "conv1_b": u(ks[5], (Cout,)),
        "bn2_gamma": pos(ks[6], (Cout,)), "bn2_beta": u(ks[7], (Cout,)),
        "bn2_mean": u(ks[8], (Cout,)),    "bn2_var": pos(ks[9], (Cout,)),
        "conv2_w": u(ks[10], (Cout, Cout, 3), 0.2), "conv2_b": u(ks[11], (Cout,)),
        "fc1_se_w": u(ks[12], (red, Cout), 0.3),
        "fc2_se_w": u(ks[13], (Cout, red), 0.3),
        "fc1_dual_w": u(ks[14], (red, Cout), 0.3),
        "fc2_dual_w": u(ks[15], (half, red), 0.3),
        "fc3_dual_w": u(ks[16], (Cout, half), 0.3),
    }
    if Cin != Cout:
        p["res_w"] = u(ks[17], (Cout, Cin, 1), 0.2)
        p["res_b"] = u(ks[18], (Cout,))
    return p


if __name__ == "__main__":
    B, C_IN, C_OUT, L = 2, 16, 32, 16          # small shapes consistent with the module

    key = jax.random.PRNGKey(0)
    k_x, k_p = jax.random.split(key)
    x = jax.random.normal(k_x, (B, C_IN, L), jnp.float32)
    params = init_params(k_p, C_IN, C_OUT, se_reduction=16)

    out = jax.block_until_ready(basic_block_forward(x, params))
    ref = basic_block_reference(x, params)

    assert out.shape == (B, C_OUT, L)
    # Tolerance absorbs MXU f32 matmul vs. HIGHEST-precision XLA conv differences;
    # any structural/semantic bug produces errors orders of magnitude larger.
    assert jnp.allclose(out, ref, atol=2e-2, rtol=2e-2), float(jnp.max(jnp.abs(out - ref)))

    print("KERNEL_OK")
</pallas_src>

<mosaic_0001>
module attributes {stable_mosaic.version = 11 : i64} {
  func.func @basic_block_kernel(%arg0: i32, %arg1: memref<1x16x16xf32, #tpu.memory_space<vmem>>, %arg2: memref<1x16xf32, #tpu.memory_space<vmem>>, %arg3: memref<1x16xf32, #tpu.memory_space<vmem>>, %arg4: memref<3x16x32xf32, #tpu.memory_space<vmem>>, %arg5: memref<1x32xf32, #tpu.memory_space<vmem>>, %arg6: memref<1x32xf32, #tpu.memory_space<vmem>>, %arg7: memref<1x32xf32, #tpu.memory_space<vmem>>, %arg8: memref<3x32x32xf32, #tpu.memory_space<vmem>>, %arg9: memref<1x32xf32, #tpu.memory_space<vmem>>, %arg10: memref<32x2xf32, #tpu.memory_space<vmem>>, %arg11: memref<2x32xf32, #tpu.memory_space<vmem>>, %arg12: memref<32x2xf32, #tpu.memory_space<vmem>>, %arg13: memref<2x16xf32, #tpu.memory_space<vmem>>, %arg14: memref<16x32xf32, #tpu.memory_space<vmem>>, %arg15: memref<16x32xf32, #tpu.memory_space<vmem>>, %arg16: memref<1x32xf32, #tpu.memory_space<vmem>>, %arg17: memref<1x16x32xf32, #tpu.memory_space<vmem>>, %arg18: memref<32x16xf32, #tpu.memory_space<vmem>>, %arg19: memref<32x32xf32, #tpu.memory_space<vmem>>) attributes {dimension_semantics = [#tpu.dimension_semantics<parallel>], iteration_bounds = array<i64: 2>, scalar_prefetch = 0 : i64, scratch_operands = 2 : i64, tpu.core_type = #tpu.core_type<tc>, window_params = [{transform_indices = @transform_0, window_bounds = array<i64: 1, 16, 16>}, {pipeline_mode = #tpu.pipeline_mode<synchronous>, transform_indices = @transform_1, window_bounds = array<i64: 1, 16>}, {pipeline_mode = #tpu.pipeline_mode<synchronous>, transform_indices = @transform_2, window_bounds = array<i64: 1, 16>}, {pipeline_mode = #tpu.pipeline_mode<synchronous>, transform_indices = @transform_3, window_bounds = array<i64: 3, 16, 32>}, {pipeline_mode = #tpu.pipeline_mode<synchronous>, transform_indices = @transform_4, window_bounds = array<i64: 1, 32>}, {pipeline_mode = #tpu.pipeline_mode<synchronous>, transform_indices = @transform_5, window_bounds = array<i64: 1, 32>}, {pipeline_mode = #tpu.pipeline_mode<synchronous>, transform_indices = @transform_6, window_bounds = array<i64: 1, 32>}, {pipeline_mode = #tpu.pipeline_mode<synchronous>, transform_indices = @transform_7, window_bounds = array<i64: 3, 32, 32>}, {pipeline_mode = #tpu.pipeline_mode<synchronous>, transform_indices = @transform_8, window_bounds = array<i64: 1, 32>}, {pipeline_mode = #tpu.pipeline_mode<synchronous>, transform_indices = @transform_9, window_bounds = array<i64: 32, 2>}, {pipeline_mode = #tpu.pipeline_mode<synchronous>, transform_indices = @transform_10, window_bounds = array<i64: 2, 32>}, {pipeline_mode = #tpu.pipeline_mode<synchronous>, transform_indices = @transform_11, window_bounds = array<i64: 32, 2>}, {pipeline_mode = #tpu.pipeline_mode<synchronous>, transform_indices = @transform_12, window_bounds = array<i64: 2, 16>}, {pipeline_mode = #tpu.pipeline_mode<synchronous>, transform_indices = @transform_13, window_bounds = array<i64: 16, 32>}, {pipeline_mode = #tpu.pipeline_mode<synchronous>, transform_indices = @transform_14, window_bounds = array<i64: 16, 32>}, {pipeline_mode = #tpu.pipeline_mode<synchronous>, transform_indices = @transform_15, window_bounds = array<i64: 1, 32>}, {transform_indices = @transform_16, window_bounds = array<i64: 1, 16, 32>}]} {
    %c0 = arith.constant 0 : index
    %c0_0 = arith.constant 0 : index
    %c0_1 = arith.constant 0 : index
    %0 = vector.load %arg1[%c0, %c0_0, %c0_1] : memref<1x16x16xf32, #tpu.memory_space<vmem>>, vector<1x16x16xf32>
    %1 = vector.shape_cast %0 : vector<1x16x16xf32> to vector<16x16xf32>
    %c0_2 = arith.constant 0 : index
    %c0_3 = arith.constant 0 : index
    %2 = vector.load %arg2[%c0_2, %c0_3] : memref<1x16xf32, #tpu.memory_space<vmem>>, vector<1x16xf32>
    %3 = vector.broadcast %2 : vector<1x16xf32> to vector<16x16xf32>
    %4 = arith.mulf %1, %3 : vector<16x16xf32>
    %c0_4 = arith.constant 0 : index
    %c0_5 = arith.constant 0 : index
    %5 = vector.load %arg3[%c0_4, %c0_5] : memref<1x16xf32, #tpu.memory_space<vmem>>, vector<1x16xf32>
    %6 = vector.broadcast %5 : vector<1x16xf32> to vector<16x16xf32>
    %7 = arith.addf %4, %6 : vector<16x16xf32>
    %cst = arith.constant 0.000000e+00 : f32
    %8 = vector.broadcast %cst : f32 to vector<16x16xf32>
    %9 = arith.maximumf %7, %8 : vector<16x16xf32>
    %cst_6 = arith.constant 0.000000e+00 : f32
    %10 = vector.broadcast %cst_6 : f32 to vector<32x16xf32>
    %c0_7 = arith.constant 0 : index
    %c0_8 = arith.constant 0 : index
    %11 = vector.load %arg18[%c0_7, %c0_8] : memref<32x16xf32, #tpu.memory_space<vmem>>, vector<32x16xf32>
    tpu.vector_store %arg18[%c0_7, %c0_8], %10 {strides = array<i32>} : memref<32x16xf32, #tpu.memory_space<vmem>>, vector<32x16xf32>,
    %c8 = arith.constant 8 : index
    %c0_9 = arith.constant 0 : index
    %12 = vector.load %arg18[%c8, %c0_9] : memref<32x16xf32, #tpu.memory_space<vmem>>, vector<16x16xf32>
    tpu.vector_store %arg18[%c8, %c0_9], %9 {strides = array<i32>} : memref<32x16xf32, #tpu.memory_space<vmem>>, vector<16x16xf32>,
    %c7 = arith.constant 7 : index
    %c0_10 = arith.constant 0 : index
    %13 = vector.load %arg18[%c7, %c0_10] : memref<32x16xf32, #tpu.memory_space<vmem>>, vector<16x16xf32>
    %c0_11 = arith.constant 0 : index
    %c0_12 = arith.constant 0 : index
    %c0_13 = arith.constant 0 : index
    %14 = vector.load %arg4[%c0_11, %c0_12, %c0_13] : memref<3x16x32xf32, #tpu.memory_space<vmem>>, vector<1x16x32xf32>
    %15 = vector.shape_cast %14 : vector<1x16x32xf32> to vector<16x32xf32>
    %cst_14 = arith.constant dense<0.000000e+00> : vector<16x32xf32>
    %16 = tpu.matmul %13, %15, %cst_14 {dimension_numbers = #tpu.dot_dimension_numbers<[1], [0], [0], [1], [0, 0, 1, 1], [], []>} : vector<16x16xf32>, vector<16x32xf32>, vector<16x32xf32> -> vector<16x32xf32>
    %c8_15 = arith.constant 8 : index
    %c0_16 = arith.constant 0 : index
    %17 = vector.load %arg18[%c8_15, %c0_16] : memref<32x16xf32, #tpu.memory_space<vmem>>, vector<16x16xf32>
    %c1 = arith.constant 1 : index
    %c0_17 = arith.constant 0 : index
    %c0_18 = arith.constant 0 : index
    %18 = vector.load %arg4[%c1, %c0_17, %c0_18] : memref<3x16x32xf32, #tpu.memory_space<vmem>>, vector<1x16x32xf32>
    %19 = vector.shape_cast %18 : vector<1x16x32xf32> to vector<16x32xf32>
    %cst_19 = arith.constant dense<0.000000e+00> : vector<16x32xf32>
    %20 = tpu.matmul %17, %19, %cst_19 {dimension_numbers = #tpu.dot_dimension_numbers<[1], [0], [0], [1], [0, 0, 1, 1], [], []>} : vector<16x16xf32>, vector<16x32xf32>, vector<16x32xf32> -> vector<16x32xf32>
    %21 = arith.addf %16, %20 : vector<16x32xf32>
    %c9 = arith.constant 9 : index
    %c0_20 = arith.constant 0 : index
    %22 = vector.load %arg18[%c9, %c0_20] : memref<32x16xf32, #tpu.memory_space<vmem>>, vector<16x16xf32>
    %c2 = arith.constant 2 : index
    %c0_21 = arith.constant 0 : index
    %c0_22 = arith.constant 0 : index
    %23 = vector.load %arg4[%c2, %c0_21, %c0_22] : memref<3x16x32xf32, #tpu.memory_space<vmem>>, vector<1x16x32xf32>
    %24 = vector.shape_cast %23 : vector<1x16x32xf32> to vector<16x32xf32>
    %cst_23 = arith.constant dense<0.000000e+00> : vector<16x32xf32>
    %25 = tpu.matmul %22, %24, %cst_23 {dimension_numbers = #tpu.dot_dimension_numbers<[1], [0], [0], [1], [0, 0, 1, 1], [], []>} : vector<16x16xf32>, vector<16x32xf32>, vector<16x32xf32> -> vector<16x32xf32>
    %26 = arith.addf %21, %25 : vector<16x32xf32>
    %c0_24 = arith.constant 0 : index
    %c0_25 = arith.constant 0 : index
    %27 = vector.load %arg5[%c0_24, %c0_25] : memref<1x32xf32, #tpu.memory_space<vmem>>, vector<1x32xf32>
    %28 = vector.broadcast %27 : vector<1x32xf32> to vector<16x32xf32>
    %29 = arith.addf %26, %28 : vector<16x32xf32>
    %c0_26 = arith.constant 0 : index
    %c0_27 = arith.constant 0 : index
    %30 = vector.load %arg6[%c0_26, %c0_27] : memref<1x32xf32, #tpu.memory_space<vmem>>, vector<1x32xf32>
    %31 = vector.broadcast %30 : vector<1x32xf32> to vector<16x32xf32>
    %32 = arith.mulf %29, %31 : vector<16x32xf32>
    %c0_28 = arith.constant 0 : index
    %c0_29 = arith.constant 0 : index
    %33 = vector.load %arg7[%c0_28, %c0_29] : memref<1x32xf32, #tpu.memory_space<vmem>>, vector<1x32xf32>
    %34 = vector.broadcast %33 : vector<1x32xf32> to vector<16x32xf32>
    %35 = arith.addf %32, %34 : vector<16x32xf32>
    %cst_30 = arith.constant 0.000000e+00 : f32
    %36 = vector.broadcast %cst_30 : f32 to vector<16x32xf32>
    %37 = arith.maximumf %35, %36 : vector<16x32xf32>
    %cst_31 = arith.constant 0.000000e+00 : f32
    %38 = vector.broadcast %cst_31 : f32 to vector<32x32xf32>
    %c0_32 = arith.constant 0 : index
    %c0_33 = arith.constant 0 : index
    %39 = vector.load %arg19[%c0_32, %c0_33] : memref<32x32xf32, #tpu.memory_space<vmem>>, vector<32x32xf32>
    tpu.vector_store %arg19[%c0_32, %c0_33], %38 {strides = array<i32>} : memref<32x32xf32, #tpu.memory_space<vmem>>, vector<32x32xf32>,
    %c8_34 = arith.constant 8 : index
    %c0_35 = arith.constant 0 : index
    %40 = vector.load %arg19[%c8_34, %c0_35] : memref<32x32xf32, #tpu.memory_space<vmem>>, vector<16x32xf32>
    tpu.vector_store %arg19[%c8_34, %c0_35], %37 {strides = array<i32>} : memref<32x32xf32, #tpu.memory_space<vmem>>, vector<16x32xf32>,
    %c7_36 = arith.constant 7 : index
    %c0_37 = arith.constant 0 : index
    %41 = vector.load %arg19[%c7_36, %c0_37] : memref<32x32xf32, #tpu.memory_space<vmem>>, vector<16x32xf32>
    %c0_38 = arith.constant 0 : index
    %c0_39 = arith.constant 0 : index
    %c0_40 = arith.constant 0 : index
    %42 = vector.load %arg8[%c0_38, %c0_39, %c0_40] : memref<3x32x32xf32, #tpu.memory_space<vmem>>, vector<1x32x32xf32>
    %43 = vector.shape_cast %42 : vector<1x32x32xf32> to vector<32x32xf32>
    %cst_41 = arith.constant dense<0.000000e+00> : vector<16x32xf32>
    %44 = tpu.matmul %41, %43, %cst_41 {dimension_numbers = #tpu.dot_dimension_numbers<[1], [0], [0], [1], [0, 0, 1, 1], [], []>} : vector<16x32xf32>, vector<32x32xf32>, vector<16x32xf32> -> vector<16x32xf32>
    %c8_42 = arith.constant 8 : index
    %c0_43 = arith.constant 0 : index
    %45 = vector.load %arg19[%c8_42, %c0_43] : memref<32x32xf32, #tpu.memory_space<vmem>>, vector<16x32xf32>
    %c1_44 = arith.constant 1 : index
    %c0_45 = arith.constant 0 : index
    %c0_46 = arith.constant 0 : index
    %46 = vector.load %arg8[%c1_44, %c0_45, %c0_46] : memref<3x32x32xf32, #tpu.memory_space<vmem>>, vector<1x32x32xf32>
    %47 = vector.shape_cast %46 : vector<1x32x32xf32> to vector<32x32xf32>
    %cst_47 = arith.constant dense<0.000000e+00> : vector<16x32xf32>
    %48 = tpu.matmul %45, %47, %cst_47 {dimension_numbers = #tpu.dot_dimension_numbers<[1], [0], [0], [1], [0, 0, 1, 1], [], []>} : vector<16x32xf32>, vector<32x32xf32>, vector<16x32xf32> -> vector<16x32xf32>
    %49 = arith.addf %44, %48 : vector<16x32xf32>
    %c9_48 = arith.constant 9 : index
    %c0_49 = arith.constant 0 : index
    %50 = vector.load %arg19[%c9_48, %c0_49] : memref<32x32xf32, #tpu.memory_space<vmem>>, vector<16x32xf32>
    %c2_50 = arith.constant 2 : index
    %c0_51 = arith.constant 0 : index
    %c0_52 = arith.constant 0 : index
    %51 = vector.load %arg8[%c2_50, %c0_51, %c0_52] : memref<3x32x32xf32, #tpu.memory_space<vmem>>, vector<1x32x32xf32>
    %52 = vector.shape_cast %51 : vector<1x32x32xf32> to vector<32x32xf32>
    %cst_53 = arith.constant dense<0.000000e+00> : vector<16x32xf32>
    %53 = tpu.matmul %50, %52, %cst_53 {dimension_numbers = #tpu.dot_dimension_numbers<[1], [0], [0], [1], [0, 0, 1, 1], [], []>} : vector<16x32xf32>, vector<32x32xf32>, vector<16x32xf32> -> vector<16x32xf32>
    %54 = arith.addf %49, %53 : vector<16x32xf32>
    %c0_54 = arith.constant 0 : index
    %c0_55 = arith.constant 0 : index
    %55 = vector.load %arg9[%c0_54, %c0_55] : memref<1x32xf32, #tpu.memory_space<vmem>>, vector<1x32xf32>
    %56 = vector.broadcast %55 : vector<1x32xf32> to vector<16x32xf32>
    %57 = arith.addf %54, %56 : vector<16x32xf32>
    %cst_56 = arith.constant dense<0.000000e+00> : vector<32xf32>
    %58 = vector.multi_reduction <add>, %57, %cst_56 [0] : vector<16x32xf32> to vector<32xf32>
    %59 = vector.shape_cast %58 : vector<32xf32> to vector<1x32xf32>
    %cst_57 = arith.constant 1.600000e+01 : f32
    %60 = vector.broadcast %cst_57 : f32 to vector<1x32xf32>
    %61 = arith.divf %59, %60 : vector<1x32xf32>
    %c0_58 = arith.constant 0 : index
    %c0_59 = arith.constant 0 : index
    %62 = vector.load %arg10[%c0_58, %c0_59] : memref<32x2xf32, #tpu.memory_space<vmem>>, vector<32x2xf32>
    %cst_60 = arith.constant dense<0.000000e+00> : vector<1x2xf32>
    %63 = tpu.matmul %61, %62, %cst_60 {dimension_numbers = #tpu.dot_dimension_numbers<[1], [0], [0], [1], [0, 0, 1, 1], [], []>} : vector<1x32xf32>, vector<32x2xf32>, vector<1x2xf32> -> vector<1x2xf32>
    %cst_61 = arith.constant 0.000000e+00 : f32
    %64 = vector.broadcast %cst_61 : f32 to vector<1x2xf32>
    %65 = arith.maximumf %63, %64 : vector<1x2xf32>
    %c0_62 = arith.constant 0 : index
    %c0_63 = arith.constant 0 : index
    %66 = vector.load %arg11[%c0_62, %c0_63] : memref<2x32xf32, #tpu.memory_space<vmem>>, vector<2x32xf32>
    %cst_64 = arith.constant dense<0.000000e+00> : vector<1x32xf32>
    %67 = tpu.matmul %65, %66, %cst_64 {dimension_numbers = #tpu.dot_dimension_numbers<[1], [0], [0], [1], [0, 0, 1, 1], [], []>} : vector<1x2xf32>, vector<2x32xf32>, vector<1x32xf32> -> vector<1x32xf32>
    %cst_65 = arith.constant 0.000000e+00 : f32
    %68 = vector.broadcast %cst_65 : f32 to vector<1x32xf32>
    %69 = arith.subf %68, %67 : vector<1x32xf32>
    %70 = math.exp %69 : vector<1x32xf32>
    %cst_66 = arith.constant 1.000000e+00 : f32
    %71 = vector.broadcast %cst_66 : f32 to vector<1x32xf32>
    %72 = arith.addf %71, %70 : vector<1x32xf32>
    %cst_67 = arith.constant 1.000000e+00 : f32
    %73 = vector.broadcast %cst_67 : f32 to vector<1x32xf32>
    %74 = arith.divf %73, %72 : vector<1x32xf32>
    %c0_68 = arith.constant 0 : index
    %c0_69 = arith.constant 0 : index
    %75 = vector.load %arg12[%c0_68, %c0_69] : memref<32x2xf32, #tpu.memory_space<vmem>>, vector<32x2xf32>
    %cst_70 = arith.constant dense<0.000000e+00> : vector<1x2xf32>
    %76 = tpu.matmul %61, %75, %cst_70 {dimension_numbers = #tpu.dot_dimension_numbers<[1], [0], [0], [1], [0, 0, 1, 1], [], []>} : vector<1x32xf32>, vector<32x2xf32>, vector<1x2xf32> -> vector<1x2xf32>
    %cst_71 = arith.constant 0.000000e+00 : f32
    %77 = vector.broadcast %cst_71 : f32 to vector<1x2xf32>
    %78 = arith.maximumf %76, %77 : vector<1x2xf32>
    %c0_72 = arith.constant 0 : index
    %c0_73 = arith.constant 0 : index
    %79 = vector.load %arg13[%c0_72, %c0_73] : memref<2x16xf32, #tpu.memory_space<vmem>>, vector<2x16xf32>
    %cst_74 = arith.constant dense<0.000000e+00> : vector<1x16xf32>
    %80 = tpu.matmul %78, %79, %cst_74 {dimension_numbers = #tpu.dot_dimension_numbers<[1], [0], [0], [1], [0, 0, 1, 1], [], []>} : vector<1x2xf32>, vector<2x16xf32>, vector<1x16xf32> -> vector<1x16xf32>
    %cst_75 = arith.constant 0.000000e+00 : f32
    %81 = vector.broadcast %cst_75 : f32 to vector<1x16xf32>
    %82 = arith.maximumf %80, %81 : vector<1x16xf32>
    %c0_76 = arith.constant 0 : index
    %c0_77 = arith.constant 0 : index
    %83 = vector.load %arg14[%c0_76, %c0_77] : memref<16x32xf32, #tpu.memory_space<vmem>>, vector<16x32xf32>
    %cst_78 = arith.constant dense<0.000000e+00> : vector<1x32xf32>
    %84 = tpu.matmul %82, %83, %cst_78 {dimension_numbers = #tpu.dot_dimension_numbers<[1], [0], [0], [1], [0, 0, 1, 1], [], []>} : vector<1x16xf32>, vector<16x32xf32>, vector<1x32xf32> -> vector<1x32xf32>
    %cst_79 = arith.constant 0.000000e+00 : f32
    %85 = vector.broadcast %cst_79 : f32 to vector<1x32xf32>
    %86 = arith.subf %85, %84 : vector<1x32xf32>
    %87 = math.exp %86 : vector<1x32xf32>
    %cst_80 = arith.constant 1.000000e+00 : f32
    %88 = vector.broadcast %cst_80 : f32 to vector<1x32xf32>
    %89 = arith.addf %88, %87 : vector<1x32xf32>
    %cst_81 = arith.constant 1.000000e+00 : f32
    %90 = vector.broadcast %cst_81 : f32 to vector<1x32xf32>
    %91 = arith.divf %90, %89 : vector<1x32xf32>
    %92 = arith.addf %74, %91 : vector<1x32xf32>
    %93 = vector.broadcast %92 : vector<1x32xf32> to vector<16x32xf32>
    %94 = arith.mulf %57, %93 : vector<16x32xf32>
    %c0_82 = arith.constant 0 : index
    %c0_83 = arith.constant 0 : index
    %95 = vector.load %arg15[%c0_82, %c0_83] : memref<16x32xf32, #tpu.memory_space<vmem>>, vector<16x32xf32>
    %cst_84 = arith.constant dense<0.000000e+00> : vector<16x32xf32>
    %96 = tpu.matmul %1, %95, %cst_84 {dimension_numbers = #tpu.dot_dimension_numbers<[1], [0], [0], [1], [0, 0, 1, 1], [], []>} : vector<16x16xf32>, vector<16x32xf32>, vector<16x32xf32> -> vector<16x32xf32>
    %c0_85 = arith.constant 0 : index
    %c0_86 = arith.constant 0 : index
    %97 = vector.load %arg16[%c0_85, %c0_86] : memref<1x32xf32, #tpu.memory_space<vmem>>, vector<1x32xf32>
    %98 = vector.broadcast %97 : vector<1x32xf32> to vector<16x32xf32>
    %99 = arith.addf %96, %98 : vector<16x32xf32>
    %100 = arith.addf %94, %99 : vector<16x32xf32>
    %c0_87 = arith.constant 0 : index
    %c0_88 = arith.constant 0 : index
    %c0_89 = arith.constant 0 : index
    %101 = vector.load %arg17[%c0_87, %c0_88, %c0_89] : memref<1x16x32xf32, #tpu.memory_space<vmem>>, vector<1x16x32xf32>
    %102 = vector.shape_cast %101 : vector<1x16x32xf32> to vector<16x32xf32>
    %103 = vector.shape_cast %100 : vector<16x32xf32> to vector<1x16x32xf32>
    tpu.vector_store %arg17[%c0_87, %c0_88, %c0_89], %103 {strides = array<i32>} : memref<1x16x32xf32, #tpu.memory_space<vmem>>, vector<1x16x32xf32>,
    return
  }
  func.func @transform_0(%arg0: i32) -> (i32, i32, i32) {
    %c0_i32 = arith.constant 0 : i32
    %c0_i32_0 = arith.constant 0 : i32
    %c0_i32_1 = arith.constant 0 : i32
    return %arg0, %c0_i32, %c0_i32_0 : i32, i32, i32
  }
  func.func @transform_1(%arg0: i32) -> (i32, i32) {
    %c0_i32 = arith.constant 0 : i32
    %c0_i32_0 = arith.constant 0 : i32
    %c0_i32_1 = arith.constant 0 : i32
    return %c0_i32, %c0_i32_0 : i32, i32
  }
  func.func @transform_2(%arg0: i32) -> (i32, i32) {
    %c0_i32 = arith.constant 0 : i32
    %c0_i32_0 = arith.constant 0 : i32
    %c0_i32_1 = arith.constant 0 : i32
    return %c0_i32, %c0_i32_0 : i32, i32
  }
  func.func @transform_3(%arg0: i32) -> (i32, i32, i32) {
    %c0_i32 = arith.constant 0 : i32
    %c0_i32_0 = arith.constant 0 : i32
    %c0_i32_1 = arith.constant 0 : i32
    %c0_i32_2 = arith.constant 0 : i32
    return %c0_i32, %c0_i32_0, %c0_i32_1 : i32, i32, i32
  }
  func.func @transform_4(%arg0: i32) -> (i32, i32) {
    %c0_i32 = arith.constant 0 : i32
    %c0_i32_0 = arith.constant 0 : i32
    %c0_i32_1 = arith.constant 0 : i32
    return %c0_i32, %c0_i32_0 : i32, i32
  }
  func.func @transform_5(%arg0: i32) -> (i32, i32) {
    %c0_i32 = arith.constant 0 : i32
    %c0_i32_0 = arith.constant 0 : i32
    %c0_i32_1 = arith.constant 0 : i32
    return %c0_i32, %c0_i32_0 : i32, i32
  }
  func.func @transform_6(%arg0: i32) -> (i32, i32) {
    %c0_i32 = arith.constant 0 : i32
    %c0_i32_0 = arith.constant 0 : i32
    %c0_i32_1 = arith.constant 0 : i32
    return %c0_i32, %c0_i32_0 : i32, i32
  }
  func.func @transform_7(%arg0: i32) -> (i32, i32, i32) {
    %c0_i32 = arith.constant 0 : i32
    %c0_i32_0 = arith.constant 0 : i32
    %c0_i32_1 = arith.constant 0 : i32
    %c0_i32_2 = arith.constant 0 : i32
    return %c0_i32, %c0_i32_0, %c0_i32_1 : i32, i32, i32
  }
  func.func @transform_8(%arg0: i32) -> (i32, i32) {
    %c0_i32 = arith.constant 0 : i32
    %c0_i32_0 = arith.constant 0 : i32
    %c0_i32_1 = arith.constant 0 : i32
    return %c0_i32, %c0_i32_0 : i32, i32
  }
  func.func @transform_9(%arg0: i32) -> (i32, i32) {
    %c0_i32 = arith.constant 0 : i32
    %c0_i32_0 = arith.constant 0 : i32
    %c0_i32_1 = arith.constant 0 : i32
    return %c0_i32, %c0_i32_0 : i32, i32
  }
  func.func @transform_10(%arg0: i32) -> (i32, i32) {
    %c0_i32 = arith.constant 0 : i32
    %c0_i32_0 = arith.constant 0 : i32
    %c0_i32_1 = arith.constant 0 : i32
    return %c0_i32, %c0_i32_0 : i32, i32
  }
  func.func @transform_11(%arg0: i32) -> (i32, i32) {
    %c0_i32 = arith.constant 0 : i32
    %c0_i32_0 = arith.constant 0 : i32
    %c0_i32_1 = arith.constant 0 : i32
    return %c0_i32, %c0_i32_0 : i32, i32
  }
  func.func @transform_12(%arg0: i32) -> (i32, i32) {
    %c0_i32 = arith.constant 0 : i32
    %c0_i32_0 = arith.constant 0 : i32
    %c0_i32_1 = arith.constant 0 : i32
    return %c0_i32, %c0_i32_0 : i32, i32
  }
  func.func @transform_13(%arg0: i32) -> (i32, i32) {
    %c0_i32 = arith.constant 0 : i32
    %c0_i32_0 = arith.constant 0 : i32
    %c0_i32_1 = arith.constant 0 : i32
    return %c0_i32, %c0_i32_0 : i32, i32
  }
  func.func @transform_14(%arg0: i32) -> (i32, i32) {
    %c0_i32 = arith.constant 0 : i32
    %c0_i32_0 = arith.constant 0 : i32
    %c0_i32_1 = arith.constant 0 : i32
    return %c0_i32, %c0_i32_0 : i32, i32
  }
  func.func @transform_15(%arg0: i32) -> (i32, i32) {
    %c0_i32 = arith.constant 0 : i32
    %c0_i32_0 = arith.constant 0 : i32
    %c0_i32_1 = arith.constant 0 : i32
    return %c0_i32, %c0_i32_0 : i32, i32
  }
  func.func @transform_16(%arg0: i32) -> (i32, i32, i32) {
    %c0_i32 = arith.constant 0 : i32
    %c0_i32_0 = arith.constant 0 : i32
    %c0_i32_1 = arith.constant 0 : i32
    return %arg0, %c0_i32, %c0_i32_0 : i32, i32, i32
  }
}

</mosaic_0001>

<bundles_post_ra>
// kernel: tpu_custom_call.1
= control target key start
LH: loop header
LB: loop body
LE: loop exit
PB: predicated region body
PF: predicated region fallthrough
CT: control target
= control target key end

     0   :  { %s2160_s0 = inlined_call_operand.hbm [shape: f32[2,16,16], index: 0, kind: input, shape index: {}]   ;;  %s2161_s1 = inlined_call_operand.hbm [shape: f32[1,16], index: 1, kind: input, shape index: {}]   ;;  %s2162_s2 = inlined_call_operand.hbm [shape: f32[1,16], index: 2, kind: input, shape index: {}]   ;;  %s2163_s3 = inlined_call_operand.vmem [shape: f32[3,16,32], index: 3, kind: input, shape index: {}]   ;;  %s2164_s4 = inlined_call_operand.hbm [shape: f32[1,32], index: 4, kind: input, shape index: {}]   ;;  %s2165_s5 = inlined_call_operand.hbm [shape: f32[1,32], index: 5, kind: input, shape index: {}]   ;;  %s2166_s6 = inlined_call_operand.vmem [shape: f32[1,32], index: 6, kind: input, shape index: {}]   ;;  %s2167_s7 = inlined_call_operand.hbm [shape: f32[3,32,32], index: 7, kind: input, shape index: {}]   ;;  %s2168_s8 = inlined_call_operand.vmem [shape: f32[1,32], index: 8, kind: input, shape index: {}]   ;;  %s2169_s9 = inlined_call_operand.vmem [shape: f32[32,2], index: 9, kind: input, shape index: {}]   ;;  %s2170_s10 = inlined_call_operand.vmem [shape: f32[2,32], index: 10, kind: input, shape index: {}]   ;;  %s2171_s11 = inlined_call_operand.vmem [shape: f32[32,2], index: 11, kind: input, shape index: {}]   ;;  %s2172_s12 = inlined_call_operand.vmem [shape: f32[2,16], index: 12, kind: input, shape index: {}]   ;;  %s2173_s13 = inlined_call_operand.vmem [shape: f32[16,32], index: 13, kind: input, shape index: {}]   ;;  %s2174_s14 = inlined_call_operand.hbm [shape: f32[16,32], index: 14, kind: input, shape index: {}]   ;;  %s2175_s15 = inlined_call_operand.vmem [shape: f32[1,32], index: 15, kind: input, shape index: {}]   ;;  %s2176_s16 = inlined_call_operand.hbm [shape: f32[2,16,32], index: 16, kind: output, shape index: {}]  }
   0x1   :  { %2182 = sst [smem:[#allocation23_spill]] %s2160_s0 }
   0x2   :  { %2183 = sst [smem:[#allocation24_spill]] %s2161_s1 }
   0x3   :  { %2184 = sst [smem:[#allocation25_spill]] %s2162_s2 }
   0x4   :  { %2185 = sst [smem:[#allocation26_spill]] %s2164_s4 }
   0x5   :  { %2186 = sst [smem:[#allocation27_spill]] %s2165_s5 }
   0x6   :  { %2187 = sst [smem:[#allocation28_spill]] %s2167_s7 }
   0x7   :  { %2188 = sst [smem:[#allocation29_spill]] %s2172_s12 }
   0x8   :  { %2189 = sst [smem:[#allocation30_spill]] %s2173_s13 }
   0x9   :  { %2190 = sst [smem:[#allocation31_spill]] %s2174_s14 }
   0xa   :  { %2191 = sst [smem:[#allocation32_spill]] %s2175_s15 }
   0xb   :  { %2192 = sst [smem:[#allocation33_spill]] %s2176_s16 }
   0xc   :  { %21 = vsyncpa [#allocation5], 0 }
   0xd   :  { %23 = vsyncpa [#allocation5 + $0x1], 0 }
   0xe   :  { %24 = vsyncpa [#allocation8], 0 }
   0xf   :  { %25 = vsyncpa [#allocation11], 0 }
  0x10   :  { %26 = vsyncpa [#allocation14], 0 }
  0x11   :  { %27 = vsyncpa [#allocation6], 0 }
  0x12   :  { %29 = vsyncpa [#allocation6 + $0x1], 0  ;;  %s1852_s21 = smov 0   ;;  %s1854_s22 = smov 0  }
  0x13   :  { %s1856_s23 = smov 0   ;;  %s1858_s24 = smov 0  }
  0x14 LB: > { %s2193_s1 = sld [smem:[#allocation24_spill]]  ;;  %s1876_s28 = sadd.s32 4294967295, %s1753_s24   ;;  %s1753_s24 = sphi %s1858_s24, %s2219_s24   ;;  %s1749_s23 = sphi %s1856_s23, %s2218_s23   ;;  %s1745_s22 = sphi %s1854_s22, %s2217_s22   ;;  %s1741_s21 = sphi %s1852_s21, %s2216_s21  }
  0x15   : > { %p1281_p0 = scmp.ge.s32.totalorder %s1753_s24, 1  ;;  %p56_p1 = scmp.eq.s32.totalorder %s1876_s28, 0 }
  0x16   : > { %p407_p2 = scmp.lt.s32.totalorder %s1753_s24, 3  ;;  %s1755_s30 = smov [#allocation7]  }
  0x17   : > { %s421_s0 = sshll.u32 %s1755_s30, 4  ;;  %s2195_s4 = sld [smem:[#allocation26_spill]]  ;;  %s422_s0 = int_to_ptr.vmem [resolvable:$true] %s421_s0 }
  0x18   : > { %p1881_p3 = pnand %p1281_p0, %p407_p2  ;;  %s1756_s25 = smov [#allocation10]  }
  0x19   : > { %s448_s26 = sshll.u32 %s1756_s25, 4  ;;  %s2197_s7 = sld [smem:[#allocation28_spill]]  ;;  %s449_s26 = int_to_ptr.vmem [resolvable:$true] %s448_s26 }
  0x1a   : > { %s419_s27 = sshll.u32 %s2193_s1, 4  ;;  %p1363_p5 = pneg %p1881_p3  ;;  %s420_s27 = int_to_ptr.hbm [resolvable:$true] %s419_s27 }
  0x1b   : > { %s1757_s17 = smov [#allocation13]   ;;  %s2198_s2 = sld [smem:[#allocation25_spill]] }
  0x1c   : > { %p1893_p6 = pnand %p1363_p5, %p56_p1  ;;  %s474_s18 = sshll.u32 %s1757_s17, 4  ;;  %s475_s18 = int_to_ptr.vmem [resolvable:$true] %s474_s18 }
  0x1d   : > { %s446_s19 = sshll.u32 %s2195_s4, 4  ;;  %s2180_s25 = smov 128   ;;  %s447_s19 = int_to_ptr.hbm [resolvable:$true] %s446_s19 }
  0x1e   : > { %1366 = dma.hbm_to_vmem [thread:$0]  (!%p1893_p6), %s420_s27, 16, %s422_s0, [#allocation8]  }
  0x1f   : > { %s472_s16 = sshll.u32 %s2197_s7, 4  ;;  %s2181_s12 = smov 8   ;;  %s473_s16 = int_to_ptr.hbm [resolvable:$true] %s472_s16 }
  0x20   : > { %1372 = dma.hbm_to_vmem [thread:$0]  (!%p1893_p6), %s447_s19, 16, %s449_s26, [#allocation11]  }
  0x21   : > { %s431_s13 = sshll.u32 %s2198_s2, 4  ;;  %s1760_s1 = smov [#allocation9]   ;;  %s432_s13 = int_to_ptr.hbm [resolvable:$true] %s431_s13 }
  0x22   : > { %1378 = dma.hbm_to_vmem [thread:$0]  (!%p1893_p6), %s473_s16, 1536, %s475_s18, [#allocation14], %s2180_s25, %s2180_s25, %s2181_s12  }
  0x23   : > { %s433_s27 = sshll.u32 %s1760_s1, 4  ;;  %s2199_s5 = sld [smem:[#allocation27_spill]]  ;;  %s434_s27 = int_to_ptr.vmem [resolvable:$true] %s433_s27 }
  0x24   : > { %1369 = dma.hbm_to_vmem [thread:$0]  (!%p1893_p6), %s432_s13, 16, %s434_s27, [#allocation8]  }
  0x25   : > { %s2200_s14 = sld [smem:[#allocation31_spill]]  ;;  %s1761_s30 = smov [#allocation12]  }
  0x26   : > { %s460_s17 = sshll.u32 %s1761_s30, 4  ;;  %s1762_s18 = smov [#allocation15]   ;;  %s461_s17 = int_to_ptr.vmem [resolvable:$true] %s460_s17 }
  0x27   : > { %s506_s13 = sshll.u32 %s1762_s18, 4  ;;  %s1280_s1 = sadd.s32 4294967294, %s1753_s24   ;;  %s507_s13 = int_to_ptr.vmem [resolvable:$true] %s506_s13 }
  0x28   : > { %s1929_s27 = sadd.s32 1, %s1753_s24   ;;  %s42_s19 = sadd.s32 1, %s1749_s23 }
  0x29   : > { %s458_s26 = sshll.u32 %s2199_s5, 4  ;;  %s39_s0 = ssub.s32 %s1753_s24, %s1929_s27  ;;  %s459_s26 = int_to_ptr.hbm [resolvable:$true] %s458_s26 }
  0x2a   : > { %1375 = dma.hbm_to_vmem [thread:$0]  (!%p1893_p6), %s459_s26, 16, %s461_s17, [#allocation11]  }
  0x2b   : > { %s504_s16 = sshll.u32 %s2200_s14, 4  ;;  %p40_p7 = scmp.eq.s32.totalorder %s39_s0, 0  ;;  %s505_s16 = int_to_ptr.hbm [resolvable:$true] %s504_s16 }
  0x2c   : > { %1381 = dma.hbm_to_vmem [thread:$0]  (!%p1893_p6), %s505_s16, 256, %s507_s13, [#allocation14], %s2180_s25, %s2180_s25, %s2181_s12  }
  0x2d   : > { %p49_p8 = scmp.ne.s32.totalorder %s1749_s23, %s1745_s22  ;;  %p50_p9 = scmp.eq.s32.totalorder %s1753_s24, 0 }
  0x2e   : > { %p55_p10 = scmp.ne.s32.totalorder %s1745_s22, %s1741_s21  ;;  %p394_p13 = scmp.eq.s32.totalorder %s1876_s28, 1 }
  0x2f   : > { %s1940_s26 = scalar_select %p40_p7, %s1749_s23, %s42_s19  }
  0x30   : > { %p1942_p11 = por %p50_p9, %p49_p8  ;;  %p1948_p12 = por %p56_p1, %p55_p10 }
  0x31   : > { %2201 = sst [smem:[#allocation22_spill]] %s1940_s26  ;;  %p400_p0 = scmp.eq.s32.totalorder %s1280_s1, 1 }
  0x32   : > { %p1396_p2 = scmp.lt.s32.totalorder %s1753_s24, 2  ;;  %s523_s15 = sand.u32 1, %s1749_s23  }
  0x33   : > { %p1955_p5 = por %p394_p13, %p49_p8  ;;  %p1959_p6 = por %p400_p0, %p55_p10 }
  0x34   : > { %s1289_s17 = sshll.u32 %s523_s15, 4  ;;  %s1331_s18 = sshll.u32 %s1753_s24, 4 }
  0x35   : > { %s2206_s19 = sld [smem:[#allocation23_spill]]  ;;  %s527_s12 = scalar_lea.vmem [#allocation4], %s1289_s17 }
  0x36   : > { %s535_s2 = sshll.u32 %s527_s12, 4  ;;  %p1969_p7 = pnand %p1396_p2, %p1942_p11  ;;  %s536_s2 = int_to_ptr.vmem [resolvable:$true] %s535_s2 }
  0x37   : > { %s524_s7 = scalar_lea.sflag [#allocation5], %s523_s15 }
  0x38   : > { %p1649_p9 = pneg %p1969_p7 }
  0x3b   : > { %s532_s25 = scalar_lea.hbm %s2206_s19, %s1331_s18 }
  0x3c   : > { %s533_s5 = sshll.u32 %s532_s25, 4  ;;  %s1652_s25 = scalar_lea.hbm %s2206_s19, 32  ;;  %s534_s5 = int_to_ptr.hbm [resolvable:$true] %s533_s5 }
  0x3d   : > { %s1645_s14 = sshra.s32 %s534_s5, 4  ;;  %s1646_s14 = int_to_ptr.hbm [resolvable:$true] %s1645_s14 }
  0x3e   : > { %s1647_s26 = scalar_lea.hbm %s1646_s14, 16  ;;  %p1653_p11 = scmp.lt.s32.totalorder %s1646_s14, %s2206_s19 }
  0x3f   : > { %p1648_p8 = scmp.ne.s32.totalorder %s1646_s14, %s1647_s26  ;;  %p1654_p0 = scmp.lt.s32.totalorder %s1652_s25, %s1647_s26 }
  0x41   : > { %p1650_p10 = pnand %p1649_p9, %p1648_p8  ;;  %p1655_p2 = por %p1654_p0, %p1653_p11 }
  0x43   : > { %p1651_p13 = pneg %p1650_p10 }
  0x45   : > { %p1656_p4 = pnand %p1655_p2, %p1651_p13 }
  0x47   : > { %1659 = shalt.err (!%p1656_p4)
}
  0x48   : > { %s2208_s15 = smov 8   ;;  %s2209_s13 = smov 128  }
  0x49   : > { %1385 = dma.hbm_to_vmem [thread:$0]  (!%p1969_p7), %s534_s5, 256, %s536_s2, %s524_s7, %s2209_s13, %s2209_s13, %s2208_s15  }
  0x4a   : > { %547 = sbr.rel (%p1881_p3) target bundleno = 873 (0x369), region = 84  ;;  %s1989_s0 = sand.u32 (!%p1881_p3), 1, %s1745_s22  }
  0x4b   : > { %s1293_s14 = sshll.u32 (!%p1881_p3), %s1989_s0, 4  ;;  %s550_s26 = scalar_lea.sflag (!%p1881_p3), [#allocation5], %s1989_s0 }
  0x4c   : > { %s553_s17 = scalar_lea.vmem (!%p1881_p3), [#allocation4], %s1293_s14 }
  0x4f   : > { %1720 = dma.done.wait (%p1948_p12), %s550_s26, 256  }
  0x50   : > { %1722 = vsyncadd (%p1948_p12), %s550_s26, 4294967040 }
  0x51   : > { %1724 = dma.done.wait (%p56_p1), [#allocation8], 32  }
  0x52   : > { %1726 = vsyncadd (%p56_p1), [#allocation8], 4294967264 }
  0x53   : > { %1728 = dma.done.wait (%p56_p1), [#allocation11], 32  }
  0x54   : > { %1730 = vsyncadd (%p56_p1), [#allocation11], 4294967264 }
  0x55   : > { %1732 = dma.done.wait (%p56_p1), [#allocation14], 1792  }
  0x56   : > { %1734 = vsyncadd (%p56_p1), [#allocation14], 4294965504  ;;  %vm649_vm0 = vcmask 130048   ;;  %v1763_v0 = vmov 0.0   ;;  %v1302_v1 = vld [vmem:[%s2163_s3 + $0x18] sm:$0xff]  ;;  %v659_v2 = vld [vmem:[%s2163_s3 + $0x8] sm:$0xff] }
  0x57   : > { %651 = vst.msk [vmem:[#allocation2 + $0x8] sm:$0xff] %vm649_vm0, %v1763_v0  ;;  %v1301_v3 = vld [vmem:[%s2163_s3 + $0x10] sm:$0xff]  ;;  %685 = vmatpush.msra.mxu0 %v1302_v1  ;;  %1333 = vmatpush.msra.mxu2 %v659_v2  ;;  %v658_v4 = vld [vmem:[%s2163_s3] sm:$0xff]  ;;  %v2029_v8 = vld [vmem:[%s553_s17 + $0x8] sm:$0xff]  ;;  %vm779_vm1 = vcmask 261120   ;;  %vm951_vm2 = vcmask 1041408  }
  0x58   : > { %650 = vst.msk [vmem:[#allocation2] sm:$0xff] %vm649_vm0, %v1763_v0  ;;  %v2027_v5 = vld [vmem:[%s553_s17] sm:$0xff]  ;;  %714 = vmatpush.msra.mxu1 %v659_v2  ;;  %v1308_v9 = vld [vmem:[%s2163_s3 + $0x28] sm:$0xff]  ;;  %v790_v25 = vld [vmem:[#allocation13 + $0x10] sm:$0xff]  ;;  %s2210_s18 = sld [smem:[#allocation29_spill]]  ;;  %vm947_vm4 = vcmask 15360  }
  0x59   : > { %652 = vst.msk [vmem:[#allocation2 + $0x10] sm:$0xff] %vm649_vm0, %v1763_v0  ;;  %v1448_v6 = vld [vmem:[#allocation7] ss:$0 sm:$0xff]  ;;  %v1449_v7 = vld [vmem:[#allocation9] ss:$0 sm:$0xff]  ;;  %686 = vmatpush.msra.mxu0 %v1301_v3  ;;  %1334 = vmatpush.msra.mxu2 %v658_v4  ;;  %v797_v26 = vld [vmem:[#allocation13 + $0x30] sm:$0xff] }
  0x5a   : > { %653 = vst.msk [vmem:[#allocation2 + $0x18] sm:$0xff] %vm649_vm0, %v1763_v0  ;;  %v1307_v10 = vld [vmem:[%s2163_s3 + $0x20] sm:$0xff]  ;;  %v639_v11 = vmul.f32 %v1448_v6, %v2027_v5  ;;  %v640_v12 = vmul.f32 %v1448_v6, %v2029_v8  ;;  %715 = vmatpush.msra.mxu1 %v658_v4  ;;  %v796_v27 = vld [vmem:[#allocation13 + $0x28] sm:$0xff]  ;;  %v795_v29 = vld [vmem:[#allocation13 + $0x20] sm:$0xff]  ;;  %s2211_s13 = sld [smem:[#allocation30_spill]]  ;;  %s1332_s2 = sshll.u32 %s1876_s28, 4 }
  0x5b   : > { %748 = vmatpush.msrb.mxu2 %v1308_v9  ;;  %781 = vst.msk [vmem:[#allocation3 + $0x8] sm:$0xff] %vm779_vm1, %v1763_v0  ;;  %v791_v23 = vld [vmem:[#allocation13 + $0x18] sm:$0xff]  ;;  %v789_v28 = vld [vmem:[#allocation13 + $0x8] sm:$0xff]  ;;  %v788_v30 = vld [vmem:[#allocation13] sm:$0xff]  ;;  %v1764_v9 = vmov 16.0   ;;  %s2212_s29 = sld [smem:[#allocation32_spill]] }
  0x5c   : > { %v645_v13 = vadd.f32 %v1449_v7, %v639_v11  ;;  %v646_v14 = vadd.f32 %v1449_v7, %v640_v12  ;;  %780 = vst.msk [vmem:[#allocation3] sm:$0xff] %vm779_vm1, %v1763_v0  ;;  %v798_v24 = vld [vmem:[#allocation13 + $0x38] sm:$0xff]  ;;  %846 = vmatpush.msrb.mxu0 %v791_v23  ;;  %v862_v32 = vld [vmem:[#allocation13 + $0x50] sm:$0xff]  ;;  %v861_v33 = vld [vmem:[#allocation13 + $0x48] sm:$0xff]  ;;  %1455 = vrcp.f32 %v1764_v9  ;;  %s2213_s12 = sld [smem:[#allocation33_spill]]  ;;  %s632_s28 = scalar_lea.vmem [#allocation16], %s1293_s14 }
  0x5d   : > { %749 = vmatpush.msrb.mxu2 %v1307_v10  ;;  %782 = vst.msk [vmem:[#allocation3 + $0x10] sm:$0xff] %vm779_vm1, %v1763_v0  ;;  %817 = vmatpush.msra.mxu3 %v798_v24  ;;  %v863_v31 = vld [vmem:[#allocation13 + $0x58] sm:$0xff]  ;;  %v860_v34 = vld [vmem:[#allocation13 + $0x40] sm:$0xff]  ;;  %v921_v62 = vld [vmem:[%s2169_s9 + $0x18] sm:$0xff]  ;;  %s1135_s15 = scalar_lea.sflag [#allocation6], %s1989_s0 }
  0x5e   : > { %v647_v15 = vmax.f32 %v645_v13, 0.0  ;;  %v648_v16 = vmax.f32 %v646_v14, 0.0  ;;  %783 = vst.msk [vmem:[#allocation3 + $0x18] sm:$0xff] %vm779_vm1, %v1763_v0  ;;  %847 = vmatpush.msrb.mxu0 %v790_v25  ;;  %882 = vmatpush.msrb.mxu1 %v863_v31  ;;  %v1450_v39 = vld [vmem:[#allocation10] ss:$0 sm:$0xff]  ;;  %v920_v63 = vld [vmem:[%s2169_s9 + $0x10] sm:$0xff] }
  0x5f   : > { %818 = vmatpush.msra.mxu3 %v797_v26  ;;  %v1451_v42 = vld [vmem:[#allocation12] ss:$0 sm:$0xff]  ;;  %v1452_v44 = vld [vmem:[%s2166_s6] ss:$0 sm:$0xff]  ;;  %v919_v0 = vld [vmem:[%s2169_s9 + $0x8] sm:$0xff] }
  0x60   : > { %654 = vst.msk [vmem:[#allocation2 + $0x8] sm:$0xff] %vm649_vm0, %v647_v15  ;;  %848 = vmatpush.msrb.mxu0 %v789_v28  ;;  %883 = vmatpush.msrb.mxu1 %v862_v32  ;;  %v918_v1 = vld [vmem:[%s2169_s9] sm:$0xff]  ;;  %v997_v4 = vld [vmem:[%s2171_s11 + $0x18] sm:$0xff]  ;;  %v996_v6 = vld [vmem:[%s2171_s11 + $0x10] sm:$0xff] }
  0x61   : > { %655 = vst.msk [vmem:[#allocation2 + $0x10] sm:$0xff] %vm649_vm0, %v648_v16  ;;  %819 = vmatpush.msra.mxu3 %v796_v27  ;;  %v995_v10 = vld [vmem:[%s2171_s11 + $0x8] sm:$0xff]  ;;  %v994_v12 = vld [vmem:[%s2171_s11] sm:$0xff] }
  0x62   : > { %849 = vmatpush.msrb.mxu0 %v788_v30  ;;  %884 = vmatpush.msrb.mxu1 %v861_v33  ;;  %v1453_v15 = vld [vmem:[%s2168_s8] ss:$0 sm:$0xff]  ;;  %s1146_s25 = scalar_lea.hbm %s2213_s12, %s1332_s2  ;;  %s1695_s5 = scalar_lea.hbm %s2213_s12, 32 }
  0x63   : > { %820 = vmatpush.msra.mxu3 %v795_v29  ;;  %s1149_s20 = sshll.u32 %s1146_s25, 4  ;;  %s1150_s20 = int_to_ptr.hbm [resolvable:$true] %s1149_s20 }
  0x64   : > { %885 = vmatpush.msrb.mxu1 %v860_v34  ;;  %s1689_s26 = sshra.s32 %s1150_s20, 4  ;;  %s1690_s26 = int_to_ptr.hbm [resolvable:$true] %s1689_s26 }
  0x65   : > { %s1691_s14 = scalar_lea.hbm %s1690_s26, 16  ;;  %p1696_p12 = scmp.lt.s32.totalorder %s1690_s26, %s2213_s12 }
  0x66   : > { %p1692_p1 = scmp.ne.s32.totalorder %s1690_s26, %s1691_s14  ;;  %p1697_p7 = scmp.lt.s32.totalorder %s1695_s5, %s1691_s14 }
  0x67   : > { %v660_v17 = vld [vmem:[#allocation2 + $0x8] sm:$0xff] }
  0x68   : > { %v656_v18 = vld [vmem:[#allocation2 + $0x7] sm:$0xff]  ;;  %1303 = vmatmul.msk.f32.vlgmr.msra.gmra.mxu0 %vm649_vm0, %v660_v17  ;;  %v657_v19 = vld [vmem:[#allocation2 + $0xf] sm:$0xff]  ;;  %v1456_v17 = vpop.eup %1455  ;;  %p1693_p3 = pnand %p1692_p1, %p1955_p5  ;;  %p1698_p8 = por %p1697_p7, %p1696_p12 }
  0x69   : > { %1305 = vmatmul.msk.f32.vlgmr.msra.gmra.mxu1 %vm649_vm0, %v656_v18  ;;  %1306 = vmatmul.msk.f32.vlgmr.msra.gmra.mxu2 %vm649_vm0, %v657_v19  ;;  %v661_v20 = vld [vmem:[#allocation2 + $0x10] sm:$0xff]  ;;  %v946_v19 = vld [vmem:[%s2170_s10] sm:$0x3]  ;;  %v911_v23 = vmul.f32 16.0, %v1456_v17  ;;  %vm915_vm3 = vweird.f32 %v1456_v17 }
  0x6a   : > { %v723_v21 = vld [vmem:[#allocation2 + $0x9] sm:$0xff]  ;;  %v724_v22 = vld [vmem:[#allocation2 + $0x11] sm:$0xff]  ;;  %937 = vmatpush.msra.mxu2 %v921_v62  ;;  %1318 = vmatpush.msk.msrb.mxu3 %vm951_vm2, %v946_v19  ;;  %v1454_v19 = vld [vmem:[%s2212_s29] ss:$0 sm:$0xff]  ;;  %p1694_p4 = pneg %p1693_p3 }
  0x6b   : > { %v912_v27 = vsub.f32 1.0, %v911_v23 }
  0x6c   : > { %938 = vmatpush.msra.mxu2 %v920_v63  ;;  %p1699_p9 = pnand %p1698_p8, %p1694_p4 }
  0x6d   : > { %v913_v30 = vmul.f32 %v1456_v17, %v912_v27 }
  0x6e   : > { %939 = vmatpush.msra.mxu2 %v919_v0 }
  0x6f   : > { %v914_v33 = vadd.f32 %v1456_v17, %v913_v30 }
  0x70   : > { %1304 = vmatmul.msk.f32.gmra.mxu0 %vm649_vm0, %v661_v20  ;;  %940 = vmatpush.msra.mxu2 %v918_v1 }
  0x71   : > { %1309 = vmatmul.msk.f32.vlgmr.msrb.gmra.mxu2 %vm649_vm0, %v723_v21 }
  0x72   : > { %1010 = vmatpush.msrb.mxu2 %v997_v4 }
  0x74   : > { %1011 = vmatpush.msrb.mxu2 %v996_v6 }
  0x76   : > { %1012 = vmatpush.msrb.mxu2 %v995_v10 }
  0x78   : > { %1013 = vmatpush.msrb.mxu2 %v994_v12 }
  0x79   : > { %1310 = vmatmul.msk.f32.gmra.mxu2 %vm649_vm0, %v724_v22 }
  0xe5   : > { %v688_v36 = vpop.f32.mrf.mxu0 }
  0xe6   : > { %v717_v37 = vpop.f32.mrf.mxu1 }
  0xe7   : > { %v718_v38 = vadd.f32 %v717_v37, %v688_v36  ;;  %v916_v36 = vsel %vm915_vm3, %v1456_v17, %v914_v33 }
  0xec   : > { %v720_v35 = vpop.f32.mrf.mxu2 }
  0xed   : > { %v691_v45 = vpop.f32.mrf.mxu0 }
  0xee   : > { %v721_v47 = vadd.f32 %v720_v35, %v691_v45  ;;  %v1047_v45 = vld [vmem:[%s2211_s13] sm:$0xff] }
  0xf4   : > { %v751_v40 = vpop.f32.mrf.mxu2 }
  0xf5   : > { %v757_v41 = vadd.f32 %v751_v40, %v718_v38  ;;  %v1048_v40 = vld [vmem:[%s2211_s13 + $0x8] sm:$0xff] }
  0xf6   : > { %1066 = vmatpush.msra.mxu0 %v1048_v40 }
  0xf7   : > { %v763_v43 = vadd.f32 %v1450_v39, %v757_v41 }
  0xf8   : > { %1067 = vmatpush.msra.mxu0 %v1047_v45 }
  0xf9   : > { %v769_v46 = vmul.f32 %v1451_v42, %v763_v43 }
  0xfb   : > { %v775_v48 = vadd.f32 %v1452_v44, %v769_v46  ;;  %v1096_v46 = vld [vmem:[#allocation15 + $0x8] sm:$0xff] }
  0xfc   : > { %v754_v49 = vpop.f32.mrf.mxu2  ;;  %1121 = vmatpush.msra.mxu1 %v1096_v46 }
  0xfd   : > { %v777_v50 = vmax.f32 %v775_v48, 0.0  ;;  %v758_v51 = vadd.f32 %v754_v49, %v721_v47  ;;  %v1095_v47 = vld [vmem:[#allocation15] sm:$0xff] }
  0xfe   : > { %1122 = vmatpush.msra.mxu1 %v1095_v47 }
  0xff   : > { %784 = vst.msk [vmem:[#allocation3 + $0x8] sm:$0xff] %vm779_vm1, %v777_v50  ;;  %v764_v52 = vadd.f32 %v1450_v39, %v758_v51  ;;  %v1019_v39 = vld [vmem:[%s2210_s18] sm:$0x3]  ;;  %s1147_s18 = sshll.u32 %s632_s28, 4  ;;  %s1148_s18 = int_to_ptr.vmem [resolvable:$true] %s1147_s18 }
 0x101   : > { %v770_v53 = vmul.f32 %v1451_v42, %v764_v52 }
 0x103   : > { %v776_v54 = vadd.f32 %v1452_v44, %v770_v53 }
 0x105   : > { %v778_v55 = vmax.f32 %v776_v54, 0.0 }
 0x106   : > { %v792_v56 = vld [vmem:[#allocation3 + $0x8] sm:$0xff] }
 0x107   : > { %v786_v57 = vld [vmem:[#allocation3 + $0x7] sm:$0xff]  ;;  %785 = vst.msk [vmem:[#allocation3 + $0x10] sm:$0xff] %vm779_vm1, %v778_v55  ;;  %1311 = vmatmul.msk.f32.vlgmr.msra.gmra.mxu3 %vm779_vm1, %v792_v56 }
 0x108   : > { %1313 = vmatmul.msk.f32.vlgmr.msrb.gmra.mxu0 %vm779_vm1, %v786_v57  ;;  %1321 = vmatpush.msk.msra.mxu3 %vm951_vm2, %v1019_v39 }
 0x10e   : > { %v793_v58 = vld [vmem:[#allocation3 + $0x10] sm:$0xff] }
 0x10f   : > { %v787_v59 = vld [vmem:[#allocation3 + $0xf] sm:$0xff]  ;;  %1312 = vmatmul.msk.f32.gmra.mxu3 %vm779_vm1, %v793_v58 }
 0x110   : > { %v857_v60 = vld [vmem:[#allocation3 + $0x9] sm:$0xff]  ;;  %1314 = vmatmul.msk.f32.gmra.mxu0 %vm779_vm1, %v787_v59  ;;  %v858_v61 = vld [vmem:[#allocation3 + $0x11] sm:$0xff] }
 0x111   : > { %1315 = vmatmul.msk.f32.vlgmr.msrb.gmra.mxu1 %vm779_vm1, %v857_v60 }
 0x119   : > { %1316 = vmatmul.msk.f32.gmra.mxu1 %vm779_vm1, %v858_v61 }
 0x121   : > { %1324 = vmatmul.msk.f32.vlgmr.msra.gmra.mxu1 %vm649_vm0, %v2027_v5 }
 0x129   : > { %1325 = vmatmul.msk.f32.gmra.mxu1 %vm649_vm0, %v2029_v8 }
 0x185   : > { %v851_v2 = vpop.f32.mrf.mxu0 }
 0x18a   : > { %v822_v3 = vpop.f32.mrf.mxu3 }
 0x18b   : > { %v852_v11 = vadd.f32 %v851_v2, %v822_v3 }
 0x18d   : > { %v854_v13 = vpop.f32.mrf.mxu0 }
 0x18e   : > { %v887_v7 = vpop.f32.mrf.mxu1 }
 0x18f   : > { %v893_v14 = vadd.f32 %v887_v7, %v852_v11 }
 0x191   : > { %v2093_v21 = vadd.f32 %v1453_v15, %v893_v14 }
 0x192   : > { %v825_v16 = vpop.f32.mrf.mxu3 }
 0x193   : > { %v855_v18 = vadd.f32 %v854_v13, %v825_v16  ;;  %v901_v25 = vsel %vm779_vm1, %v2093_v21, 0.0 }
 0x196   : > { %v890_v20 = vpop.f32.mrf.mxu1 }
 0x197   : > { %v894_v22 = vadd.f32 %v890_v20, %v855_v18 }
 0x199   : > { %v2095_v24 = vadd.f32 %v1453_v15, %v894_v22 }
 0x19b   : > { %v902_v26 = vsel %vm779_vm1, %v2095_v24, 0.0 }
 0x19c   : > { %v903_v28 = vadd.f32 %v902_v26, %v901_v25 }
 0x19e   : > { %v904_v29 = vrot.slane %v903_v28, 4  ;;  %v1124_v63 = vpop.f32.mrf.mxu1 }
 0x19f   : > { %v1125_v25 = vadd.f32 %v1454_v19, %v1124_v63 }
 0x1a0   : > { %v905_v31 = vadd.f32 %v904_v29, %v903_v28 }
 0x1a2   : > { %v906_v32 = vrot.slane %v905_v31, 2 }
 0x1a4   : > { %v907_v34 = vadd.f32 %v906_v32, %v905_v31 }
 0x1a6   : > { %v908_v35 = vrot.slane %v907_v34, 1  ;;  %v1127_v17 = vpop.f32.mrf.mxu1 }
 0x1a7   : > { %v1128_v22 = vadd.f32 %v1454_v19, %v1127_v17 }
 0x1a8   : > { %v909_v37 = vadd.f32 %v908_v35, %v907_v34 }
 0x1aa   : > { %v917_v38 = vmul.f32 %v916_v36, %v909_v37 }
 0x1ac   : > { %1317 = vmatmul.msk.f32.vlgmr.msra.gmra.mxu2 %vm779_vm1, %v917_v38 }
 0x1b4   : > { %1320 = vmatmul.msk.f32.vlgmr.msrb.gmra.mxu2 %vm779_vm1, %v917_v38 }
 0x22f   : > { %v942_v41 = vpop.f32.mrf.mxu2 }
 0x230   : > { %v945_v42 = vmax.f32 %v942_v41, 0.0 }
 0x232   : > { %1319 = vmatmul.msk.f32.vlgmr.msrb.gmra.mxu3 %vm947_vm4, %v945_v42 }
 0x237   : > { %v1015_v43 = vpop.f32.mrf.mxu2 }
 0x238   : > { %v1018_v44 = vmax.f32 %v1015_v43, 0.0 }
 0x23a   : > { %1322 = vmatmul.msk.f32.vlgmr.msra.gmra.mxu3 %vm947_vm4, %v1018_v44 }
 0x2b5   : > { %v972_v48 = vpop.f32.mrf.mxu3 }
 0x2b6   : > { %v975_v51 = vsub.f32 0.0, %v972_v48 }
 0x2b8   : > { %v976_v52 = vmul.f32 1.442695, %v975_v51 }
 0x2ba   : > { %1457 = vpow2.f32 %v976_v52 }
 0x2bd   : > { %v1043_v49 = vpop.f32.mrf.mxu3 }
 0x2be   : > { %v1046_v50 = vmax.f32 %v1043_v49, 0.0 }
 0x2c0   : > { %1323 = vmatmul.msk.f32.vlgmr.msra.gmra.mxu0 %vm649_vm0, %v1046_v50  ;;  %v1458_v53 = vpop.eup %1457 }
 0x2c1   : > { %v978_v54 = vadd.f32 1.0, %v1458_v53 }
 0x2c3   : > { %1459 = vrcp.f32 %v978_v54  ;;  %vm984_vm6 = vweird.f32 %v978_v54  ;;  %v990_v3 = vand.u32 2147483648, %v978_v54  ;;  %v988_v6 = vand.u32 2147483647, %v978_v54 }
 0x2c5   : > { %v991_v12 = vor.u32 1.1754944e-38, %v990_v3  ;;  %vm989_vm11 = vcmp.eq.f32.partialorder %v988_v6, 8.507059e+37 }
 0x2c9   : > { %v1460_v58 = vpop.eup %1459 }
 0x2ca   : > { %v980_v59 = vmul.f32 %v1460_v58, %v978_v54  ;;  %vm985_vm5 = vweird.f32 %v1460_v58 }
 0x2cb   : > { %vm986_vm8 = vmor %vm984_vm6, %vm985_vm5 }
 0x2cc   : > { %v981_v8 = vsub.f32 1.0, %v980_v59 }
 0x2ce   : > { %v982_v61 = vmul.f32 %v1460_v58, %v981_v8 }
 0x2d0   : > { %v983_v2 = vadd.f32 %v1460_v58, %v982_v61 }
 0x2d2   : > { %v987_v10 = vsel %vm986_vm8, %v1460_v58, %v983_v2 }
 0x2d3   : > { %v992_v15 = vsel %vm989_vm11, %v991_v12, %v987_v10 }
 0x33d   : > { %v1069_v55 = vpop.f32.mrf.mxu0 }
 0x33e   : > { %v1072_v56 = vsub.f32 0.0, %v1069_v55 }
 0x340   : > { %v1073_v57 = vmul.f32 1.442695, %v1072_v56 }
 0x342   : > { %1461 = vpow2.f32 %v1073_v57 }
 0x348   : > { %v1462_v5 = vpop.eup %1461 }
 0x349   : > { %v1075_v60 = vadd.f32 1.0, %v1462_v5 }
 0x34b   : > { %1463 = vrcp.f32 %v1075_v60  ;;  %v1087_v4 = vand.u32 2147483648, %v1075_v60  ;;  %v1085_v9 = vand.u32 2147483647, %v1075_v60  ;;  %vm1081_vm9 = vweird.f32 %v1075_v60 }
 0x34d   : > { %v1088_v13 = vor.u32 1.1754944e-38, %v1087_v4  ;;  %vm1086_vm12 = vcmp.eq.f32.partialorder %v1085_v9, 8.507059e+37 }
 0x351   : > { %v1464_v62 = vpop.eup %1463 }
 0x352   : > { %v1077_v0 = vmul.f32 %v1464_v62, %v1075_v60  ;;  %vm1082_vm7 = vweird.f32 %v1464_v62 }
 0x353   : > { %vm1083_vm10 = vmor %vm1081_vm9, %vm1082_vm7 }
 0x354   : > { %v1078_v1 = vsub.f32 1.0, %v1077_v0 }
 0x356   : > { %v1079_v7 = vmul.f32 %v1464_v62, %v1078_v1 }
 0x358   : > { %v1080_v11 = vadd.f32 %v1464_v62, %v1079_v7 }
 0x35a   : > { %v1084_v14 = vsel %vm1083_vm10, %v1464_v62, %v1080_v11 }
 0x35b   : > { %v1089_v16 = vsel %vm1086_vm12, %v1088_v13, %v1084_v14 }
 0x35c   : > { %v1091_v18 = vadd.f32 %v1089_v16, %v992_v15 }
 0x35e   : > { %v1092_v20 = vperm.slane %v1091_v18, 0 }
 0x360   : > { %v1093_v23 = vmul.f32 %v1092_v20, %v2093_v21  ;;  %v1094_v26 = vmul.f32 %v1092_v20, %v2095_v24 }
 0x362   : > { %v1130_v27 = vadd.f32 %v1125_v25, %v1093_v23  ;;  %v1131_v28 = vadd.f32 %v1128_v22, %v1094_v26 }
 0x364   : > { %1132 = vst.msk [vmem:[%s632_s28] sm:$0xff] %vm779_vm1, %v1130_v27 }
 0x365   : > { %1133 = vst.msk [vmem:[%s632_s28 + $0x8] sm:$0xff] %vm779_vm1, %v1131_v28 }
 0x366   : > { %1702 = shalt.err (!%p1699_p9)
}
 0x367   : > { %s1765_s0 = smov 128   ;;  %s1766_s4 = smov 8  }
 0x368   : > { %1361 = dma.vmem_to_hbm [thread:$0]  (%p1955_p5), %s1148_s18, 256, %s1150_s20, %s1135_s15, %s1765_s0, %s1765_s0, %s1766_s4  }
 0x369 PF: > { %s1164_s1 = sand.u32 1, %s1741_s21   ;;  %p2214_p10 = scmp.ge.s32.totalorder %s1753_s24, 2 }
 0x36a   : > { %s1165_s25 = scalar_lea.sflag [#allocation6], %s1164_s1 }
 0x36b   : > { %p1387_p13 = pnand %p2214_p10, %p1959_p6 }
 0x36d   : > { %p1388_p11 = pneg %p1387_p13 }
 0x36f   : > { %1736 = dma.done.wait (%p1388_p11), %s1165_s25, 256  }
 0x370   : > { %1738 = vsyncadd (%p1388_p11), %s1165_s25, 4294967040  ;;  %s2215_s28 = sld [smem:[#allocation22_spill]]  ;;  %p32_p0 = scmp.ge.s32.totalorder %s1929_s27, 4  }
 0x371   : > { %s2216_s21 = smov %s1745_s22  ;;  %s2217_s22 = smov %s1749_s23 }
 0x372   : > { %s2219_s24 = smov %s1929_s27  ;;  %34 = sbr.rel (!%p32_p0) target bundleno = 20 (0x14), region = 157 }
 0x376   : > { %s2218_s23 = smov %s2215_s28 }
 0x377   :  { %1171 = vsyncpa [#allocation5], 1 }
 0x378   :  { %1173 = vsyncpa [#allocation5 + $0x1], 1 }
 0x379   :  { %1174 = vsyncpa [#allocation8], 1 }
 0x37a   :  { %1175 = vsyncpa [#allocation11], 1 }
 0x37b   :  { %1176 = vsyncpa [#allocation14], 1 }
 0x37c   :  { %1177 = vsyncpa [#allocation6], 1 }
 0x37d   :  { %1179 = vsyncpa [#allocation6 + $0x1], 1 }

</bundles_post_ra>
